<compile_context>
chip_gen: v7x
topology: tpu7x:2x2x1
jax: 0.10.0
libtpu: 0.0.40
codegen_flags: <defaults>
</compile_context>

<pallas_src>
import jax
import jax.numpy as jnp
from jax.experimental import pallas as pl
from jax.experimental.pallas import tpu as pltpu


def _round_up(x: int, m: int) -> int:
    return ((x + m - 1) // m) * m


def _choose_tm(m: int, block_m: int = 512) -> int:
    """Batch tile: multiple of 8, balanced (minimal padding waste), and
    yielding >= 2 tiles when possible so v7x megacore splits the work."""
    n_tiles = max(1, -(-m // block_m))
    if m >= 16:
        n_tiles = max(n_tiles, 2)
    tm = _round_up(-(-m // n_tiles), 8)
    return tm


# ----------------------------------------------------------------------------
# One-time parameter preparation (hoisted out of the forward pass).
# ----------------------------------------------------------------------------
def prepare_deep_params(params, eps: float = 1e-5):
    """Fold Linear bias + eval-mode BatchNorm into per-layer (w_folded, shift):

        relu(((x @ W^T + b) - mean) / sqrt(var+eps) * gamma + beta)
      = relu(x @ (W^T * scale) + shift),   scale = gamma / sqrt(var+eps)
                                           shift = (b - mean) * scale + beta

    Weights are transposed and lane-padded (multiples of 128) once.
    Returns a list of (w_padded (Kp, Np), shift_padded (1, Np), K, N).
    """
    prepared = []
    for p in params:
        w = p["w"].astype(jnp.float32)              # (d_out, d_in)
        b = p["b"].astype(jnp.float32)
        gamma = p["gamma"].astype(jnp.float32)
        beta = p["beta"].astype(jnp.float32)
        mean = p["running_mean"].astype(jnp.float32)
        var = p["running_var"].astype(jnp.float32)

        scale = gamma / jnp.sqrt(var + eps)
        shift = (b - mean) * scale + beta
        w_folded = w.T * scale[None, :]             # (d_in, d_out), scale folded in

        K, N = w_folded.shape
        Kp, Np = _round_up(K, 128), _round_up(N, 128)
        w_p = jnp.pad(w_folded, ((0, Kp - K), (0, Np - N)))
        shift_p = jnp.pad(shift.reshape(1, N), ((0, 0), (0, Np - N)))
        prepared.append((w_p, shift_p, K, N))
    return prepared


# ----------------------------------------------------------------------------
# Fused multi-layer kernel: grid over batch tiles only.
# ----------------------------------------------------------------------------
def _deep_fused_kernel(x_ref, *refs):
    # refs = (w_0, shift_0, w_1, shift_1, ..., o_ref)
    o_ref = refs[-1]
    wb = refs[:-1]
    n_layers = len(wb) // 2

    h = x_ref[...].astype(jnp.float32)
    for l in range(n_layers):                       # static unroll over layers
        w = wb[2 * l][...]                          # (Kp_l, Np_l) VMEM-resident
        shift = wb[2 * l + 1][...]                  # (1, Np_l)
        h = jnp.dot(h, w, preferred_element_type=jnp.float32) + shift
        h = jnp.maximum(h, 0.0)
    o_ref[...] = h.astype(o_ref.dtype)


def deep_apply(x, prepared, *, block_m: int = 512):
    """Apply the fused deep tower to x (B, d_in) using prepared params."""
    M, K0 = x.shape
    K0p = prepared[0][0].shape[0]
    assert K0 <= K0p
    N_last = prepared[-1][3]
    Np_last = prepared[-1][0].shape[1]

    tm = _choose_tm(M, block_m)
    Mp = _round_up(M, tm)

    # Pad the activation ONCE (padded K columns hit zero weight rows).
    x_p = jnp.pad(x, ((0, Mp - M), (0, K0p - K0)))

    # Interleave (weight, shift) inputs; constant index maps -> VMEM resident.
    flat_inputs = [x_p]
    in_specs = [pl.BlockSpec((tm, K0p), lambda i: (i, 0))]
    for (w_p, shift_p, _, _) in prepared:
        Kp, Np = w_p.shape
        flat_inputs.append(w_p)
        in_specs.append(pl.BlockSpec((Kp, Np), lambda i: (0, 0)))
        flat_inputs.append(shift_p)
        in_specs.append(pl.BlockSpec((1, Np), lambda i: (0, 0)))

    out_spec = pl.BlockSpec((tm, Np_last), lambda i: (i, 0))

    # VMEM budget: 2x (double-buffered) activation in/out tiles + all
    # resident weights/shifts + the intermediate activation per layer.
    f32 = 4
    weights_bytes = sum(w.size + s.size for (w, s, _, _) in prepared) * f32
    act_bytes = 2 * (tm * K0p + tm * Np_last) * f32
    inter_bytes = sum(tm * w.shape[1] for (w, _, _, _) in prepared) * f32
    est = weights_bytes + act_bytes + inter_bytes
    vmem_limit = int(min(48 * 1024 * 1024, max(32 * 1024 * 1024, 2 * est)))

    out = pl.pallas_call(
        _deep_fused_kernel,
        out_shape=jax.ShapeDtypeStruct((Mp, Np_last), x.dtype),
        grid_spec=pltpu.PrefetchScalarGridSpec(
            num_scalar_prefetch=0,
            grid=(Mp // tm,),
            in_specs=in_specs,
            out_specs=out_spec,
        ),
        compiler_params=pltpu.CompilerParams(
            dimension_semantics=("parallel",),
            vmem_limit_bytes=vmem_limit,
        ),
    )(*flat_inputs)
    return out[:M, :N_last]


def deep_forward(x, params, *, eps: float = 1e-5, block_m: int = 512):
    """Inference-mode forward of the `Deep` MLP.

    x: (B, d_in).
    params: list of per-layer dicts with keys
        'w' (d_out, d_in), 'b' (d_out,), 'gamma', 'beta',
        'running_mean', 'running_var' (all (d_out,)).
    """
    prepared = prepare_deep_params(params, eps)
    return deep_apply(x, prepared, block_m=block_m)


def deep_reference(x, params, eps: float = 1e-5):
    """Pure-JAX reference mirroring the PyTorch module in eval() mode."""
    h = x.astype(jnp.float32)
    for p in params:
        h = h @ p["w"].astype(jnp.float32).T + p["b"].astype(jnp.float32)
        h = ((h - p["running_mean"]) / jnp.sqrt(p["running_var"] + eps)
             * p["gamma"] + p["beta"])
        h = jnp.maximum(h, 0.0)
        # Dropout: identity at inference.
    return h.astype(x.dtype)


if __name__ == "__main__":
    batch, d_in = 32, 32
    d_layers = [64, 32]
    dropout = 0.1  # unused at inference

    key = jax.random.PRNGKey(0)
    kx, key = jax.random.split(key)
    x = jax.random.normal(kx, (batch, d_in), dtype=jnp.float32)

    params = []
    prev = d_in
    for d in d_layers:
        kw, kb, kg, kbt, km, kv, key = jax.random.split(key, 7)
        bound = 1.0 / (prev ** 0.5)
        params.append(dict(
            w=jax.random.uniform(kw, (d, prev), jnp.float32, -bound, bound),
            b=jax.random.uniform(kb, (d,), jnp.float32, -bound, bound),
            gamma=jax.random.uniform(kg, (d,), jnp.float32, 0.5, 1.5),
            beta=0.1 * jax.random.normal(kbt, (d,), jnp.float32),
            running_mean=0.1 * jax.random.normal(km, (d,), jnp.float32),
            running_var=jax.random.uniform(kv, (d,), jnp.float32, 0.5, 1.5),
        ))
        prev = d

    # One-time parameter prep (hoisted), then the single fused pallas_call.
    prepared = prepare_deep_params(params)
    out = deep_apply(x, prepared)
    jax.block_until_ready(out)

    ref = deep_reference(x, params)
    assert out.shape == (batch, d_layers[-1])
    assert jnp.allclose(out, ref, atol=1e-4, rtol=1e-4), "mismatch vs reference"

    print("KERNEL_OK")
</pallas_src>

<mosaic_0001>
module attributes {stable_mosaic.version = 11 : i64} {
  func.func @_deep_fused_kernel(%arg0: i32, %arg1: memref<16x128xf32, #tpu.memory_space<vmem>>, %arg2: memref<128x128xf32, #tpu.memory_space<vmem>>, %arg3: memref<1x128xf32, #tpu.memory_space<vmem>>, %arg4: memref<128x128xf32, #tpu.memory_space<vmem>>, %arg5: memref<1x128xf32, #tpu.memory_space<vmem>>, %arg6: memref<16x128xf32, #tpu.memory_space<vmem>>) attributes {dimension_semantics = [#tpu.dimension_semantics<parallel>], iteration_bounds = array<i64: 2>, scalar_prefetch = 0 : i64, scratch_operands = 0 : i64, tpu.core_type = #tpu.core_type<tc>, window_params = [{transform_indices = @transform_0, window_bounds = array<i64: 16, 128>}, {pipeline_mode = #tpu.pipeline_mode<synchronous>, transform_indices = @transform_1, window_bounds = array<i64: 128, 128>}, {pipeline_mode = #tpu.pipeline_mode<synchronous>, transform_indices = @transform_2, window_bounds = array<i64: 1, 128>}, {pipeline_mode = #tpu.pipeline_mode<synchronous>, transform_indices = @transform_3, window_bounds = array<i64: 128, 128>}, {pipeline_mode = #tpu.pipeline_mode<synchronous>, transform_indices = @transform_4, window_bounds = array<i64: 1, 128>}, {transform_indices = @transform_5, window_bounds = array<i64: 16, 128>}]} {
    %c0 = arith.constant 0 : index
    %c0_0 = arith.constant 0 : index
    %0 = vector.load %arg1[%c0, %c0_0] : memref<16x128xf32, #tpu.memory_space<vmem>>, vector<16x128xf32>
    %c0_1 = arith.constant 0 : index
    %c0_2 = arith.constant 0 : index
    %1 = vector.load %arg2[%c0_1, %c0_2] : memref<128x128xf32, #tpu.memory_space<vmem>>, vector<128x128xf32>
    %c0_3 = arith.constant 0 : index
    %c0_4 = arith.constant 0 : index
    %2 = vector.load %arg3[%c0_3, %c0_4] : memref<1x128xf32, #tpu.memory_space<vmem>>, vector<1x128xf32>
    %cst = arith.constant dense<0.000000e+00> : vector<16x128xf32>
    %3 = tpu.matmul %0, %1, %cst {dimension_numbers = #tpu.dot_dimension_numbers<[1], [0], [0], [1], [0, 0, 1, 1], [], []>} : vector<16x128xf32>, vector<128x128xf32>, vector<16x128xf32> -> vector<16x128xf32>
    %4 = vector.broadcast %2 : vector<1x128xf32> to vector<16x128xf32>
    %5 = arith.addf %3, %4 : vector<16x128xf32>
    %cst_5 = arith.constant 0.000000e+00 : f32
    %6 = vector.broadcast %cst_5 : f32 to vector<16x128xf32>
    %7 = arith.maximumf %5, %6 : vector<16x128xf32>
    %c0_6 = arith.constant 0 : index
    %c0_7 = arith.constant 0 : index
    %8 = vector.load %arg4[%c0_6, %c0_7] : memref<128x128xf32, #tpu.memory_space<vmem>>, vector<128x128xf32>
    %c0_8 = arith.constant 0 : index
    %c0_9 = arith.constant 0 : index
    %9 = vector.load %arg5[%c0_8, %c0_9] : memref<1x128xf32, #tpu.memory_space<vmem>>, vector<1x128xf32>
    %cst_10 = arith.constant dense<0.000000e+00> : vector<16x128xf32>
    %10 = tpu.matmul %7, %8, %cst_10 {dimension_numbers = #tpu.dot_dimension_numbers<[1], [0], [0], [1], [0, 0, 1, 1], [], []>} : vector<16x128xf32>, vector<128x128xf32>, vector<16x128xf32> -> vector<16x128xf32>
    %11 = vector.broadcast %9 : vector<1x128xf32> to vector<16x128xf32>
    %12 = arith.addf %10, %11 : vector<16x128xf32>
    %cst_11 = arith.constant 0.000000e+00 : f32
    %13 = vector.broadcast %cst_11 : f32 to vector<16x128xf32>
    %14 = arith.maximumf %12, %13 : vector<16x128xf32>
    %c0_12 = arith.constant 0 : index
    %c0_13 = arith.constant 0 : index
    %15 = vector.load %arg6[%c0_12, %c0_13] : memref<16x128xf32, #tpu.memory_space<vmem>>, vector<16x128xf32>
    tpu.vector_store %arg6[%c0_12, %c0_13], %14 {strides = array<i32>} : memref<16x128xf32, #tpu.memory_space<vmem>>, vector<16x128xf32>,
    return
  }
  func.func @transform_0(%arg0: i32) -> (i32, i32) {
    %c0_i32 = arith.constant 0 : i32
    %c0_i32_0 = arith.constant 0 : i32
    return %arg0, %c0_i32 : i32, i32
  }
  func.func @transform_1(%arg0: i32) -> (i32, i32) {
    %c0_i32 = arith.constant 0 : i32
    %c0_i32_0 = arith.constant 0 : i32
    %c0_i32_1 = arith.constant 0 : i32
    return %c0_i32, %c0_i32_0 : i32, i32
  }
  func.func @transform_2(%arg0: i32) -> (i32, i32) {
    %c0_i32 = arith.constant 0 : i32
    %c0_i32_0 = arith.constant 0 : i32
    %c0_i32_1 = arith.constant 0 : i32
    return %c0_i32, %c0_i32_0 : i32, i32
  }
  func.func @transform_3(%arg0: i32) -> (i32, i32) {
    %c0_i32 = arith.constant 0 : i32
    %c0_i32_0 = arith.constant 0 : i32
    %c0_i32_1 = arith.constant 0 : i32
    return %c0_i32, %c0_i32_0 : i32, i32
  }
  func.func @transform_4(%arg0: i32) -> (i32, i32) {
    %c0_i32 = arith.constant 0 : i32
    %c0_i32_0 = arith.constant 0 : i32
    %c0_i32_1 = arith.constant 0 : i32
    return %c0_i32, %c0_i32_0 : i32, i32
  }
  func.func @transform_5(%arg0: i32) -> (i32, i32) {
    %c0_i32 = arith.constant 0 : i32
    %c0_i32_0 = arith.constant 0 : i32
    return %arg0, %c0_i32 : i32, i32
  }
}

</mosaic_0001>

<bundles_post_ra>
// kernel: tpu_custom_call.1
= control target key start
LH: loop header
LB: loop body
LE: loop exit
PB: predicated region body
PF: predicated region fallthrough
CT: control target
= control target key end

     0   :  { %10 = vsyncpa [#allocation3], 0  ;;  %s1300_s0 = inlined_call_operand.hbm [shape: f32[32,128], index: 0, kind: input, shape index: {}]   ;;  %s1301_s1 = inlined_call_operand.hbm [shape: f32[128,128], index: 1, kind: input, shape index: {}]   ;;  %s1302_s2 = inlined_call_operand.vmem [shape: f32[1,128], index: 2, kind: input, shape index: {}]   ;;  %s1303_s3 = inlined_call_operand.hbm [shape: f32[128,128], index: 3, kind: input, shape index: {}]   ;;  %s1304_s4 = inlined_call_operand.vmem [shape: f32[1,128], index: 4, kind: input, shape index: {}]   ;;  %s1305_s5 = inlined_call_operand.hbm [shape: f32[32,128], index: 5, kind: output, shape index: {}]  }
   0x1   :  { %12 = vsyncpa [#allocation3 + $0x1], 0 }
   0x2   :  { %13 = vsyncpa [#allocation6], 0 }
   0x3   :  { %14 = vsyncpa [#allocation4], 0 }
   0x4   :  { %16 = vsyncpa [#allocation4 + $0x1], 0  ;;  %s1043_s18 = smov 0   ;;  %s1045_s19 = smov 0  }
   0x5   :  { %s1047_s20 = smov 0   ;;  %s1049_s21 = smov 0  }
   0x6 LB: > { %s1064_s22 = sadd.s32 4294967295, %s1003_s21   ;;  %s584_s23 = sadd.s32 4294967294, %s1003_s21   ;;  %s1003_s21 = sphi %s1049_s21, %s1325_s21   ;;  %s999_s20 = sphi %s1047_s20, %s1324_s20   ;;  %s995_s19 = sphi %s1045_s19, %s1323_s19   ;;  %s991_s18 = sphi %s1043_s18, %s1322_s18  }
   0x7   : > { %p42_p0 = scmp.ne.s32.totalorder %s995_s19, %s991_s18  ;;  %p1306_p1 = scmp.eq.s32.totalorder %s1064_s22, 0 }
   0x8   : > { %p156_p3 = scmp.eq.s32.totalorder %s584_s23, 1  ;;  %p585_p5 = scmp.ge.s32.totalorder %s1003_s21, 1 }
   0x9   : > { %p1073_p4 = por %p1306_p1, %p42_p0  ;;  %p163_p7 = scmp.lt.s32.totalorder %s1003_s21, 3 }
   0xa   : > { %p1078_p6 = por %p156_p3, %p42_p0  ;;  %s1005_s27 = smov [#allocation5]  }
   0xb   : > { %s1309_s24 = scalar_select %p1073_p4, 1, 0 }
   0xc   : > { %s1310_s25 = scalar_select %p1078_p6, 1, 0 }
   0xd   : > { %p1083_p8 = pnand %p585_p5, %p163_p7  ;;  %s175_s28 = sshll.u32 %s1005_s27, 4  ;;  %s1087_s28 = int_to_ptr.vmem [resolvable:$true] %s175_s28 }
   0xe   : > { %s1006_s30 = smov [#allocation7]   ;;  %s847_s9 = scalar_lea.hbm %s1301_s1, 2048 }
   0xf   : > { %p788_p9 = pneg %p1083_p8  ;;  %s191_s6 = sshll.u32 %s1006_s30, 4  ;;  %s1098_s6 = int_to_ptr.vmem [resolvable:$true] %s191_s6 }
  0x10   : > { %p848_p12 = scmp.ne.s32.totalorder %s1301_s1, %s847_s9  ;;  %p854_p5 = scmp.lt.u32.totalorder %s847_s9, %s1301_s1 }
  0x11   : > { %p1094_p11 = pnand %p788_p9, %p1306_p1 }
  0x13   : > { %p849_p13 = pneg %p1094_p11 }
  0x15   : > { %p850_p0 = pnand %p849_p13, %p848_p12 }
  0x17   : > { %p851_p3 = pneg %p850_p0 }
  0x19   : > { %p856_p7 = pnand %p854_p5, %p851_p3 }
  0x1b   : > { %859 = shalt.err (!%p856_p7)
}
  0x1c   : > { %s860_s14 = scalar_lea.vmem %s1087_s28, 2048  ;;  %p868_p2 = scmp.lt.s32.totalorder %s1087_s28, %s1087_s28 }
  0x1d   : > { %p861_p9 = scmp.ne.s32.totalorder %s1087_s28, %s860_s14  ;;  %p869_p12 = scmp.lt.s32.totalorder %s860_s14, %s860_s14 }
  0x1f   : > { %p863_p10 = pnand %p861_p9, %p849_p13  ;;  %p870_p0 = por %p869_p12, %p868_p2 }
  0x21   : > { %p864_p1 = pneg %p863_p10 }
  0x23   : > { %p871_p6 = pnand %p870_p0, %p864_p1 }
  0x25   : > { %874 = shalt.err (!%p871_p6)
}
  0x26   : > { %s1007_s15 = smov 128   ;;  %s1008_s16 = smov 8  }
  0x27   : > { %791 = dma.hbm_to_vmem [thread:$0]  (!%p1094_p11), %s1301_s1, 2048, %s1087_s28, [#allocation6], %s1007_s15, %s1007_s15, %s1008_s16  }
  0x28   : > { %s875_s7 = scalar_lea.hbm %s1303_s3, 2048 }
  0x29   : > { %p876_p1 = scmp.ne.s32.totalorder %s1303_s3, %s875_s7  ;;  %p882_p10 = scmp.lt.u32.totalorder %s875_s7, %s1303_s3 }
  0x2b   : > { %p878_p2 = pnand %p876_p1, %p849_p13 }
  0x2d   : > { %p879_p6 = pneg %p878_p2 }
  0x2f   : > { %p884_p3 = pnand %p882_p10, %p879_p6 }
  0x31   : > { %887 = shalt.err (!%p884_p3)
}
  0x32   : > { %s888_s28 = scalar_lea.vmem %s1098_s6, 2048  ;;  %p896_p12 = scmp.lt.s32.totalorder %s1098_s6, %s1098_s6 }
  0x33   : > { %p889_p5 = scmp.ne.s32.totalorder %s1098_s6, %s888_s28  ;;  %p897_p0 = scmp.lt.s32.totalorder %s888_s28, %s888_s28 }
  0x35   : > { %p891_p7 = pnand %p889_p5, %p849_p13  ;;  %p898_p1 = por %p897_p0, %p896_p12 }
  0x37   : > { %p892_p9 = pneg %p891_p7 }
  0x39   : > { %p899_p2 = pnand %p898_p1, %p892_p9 }
  0x3b   : > { %902 = shalt.err (!%p899_p2)
}
  0x3c   : > { %794 = dma.hbm_to_vmem [thread:$0]  (!%p1094_p11), %s1303_s3, 2048, %s1098_s6, [#allocation6], %s1007_s15, %s1007_s15, %s1008_s16  }
  0x3d   : > { %s1159_s29 = sadd.s32 1, %s1003_s21   ;;  %s29_s14 = sadd.s32 1, %s999_s20 }
  0x3e   : > { %s26_s17 = ssub.s32 %s1003_s21, %s1159_s29  ;;  %p36_p13 = scmp.ne.s32.totalorder %s999_s20, %s995_s19 }
  0x3f   : > { %p27_p6 = scmp.eq.s32.totalorder %s26_s17, 0  ;;  %p37_p10 = scmp.eq.s32.totalorder %s1003_s21, 0 }
  0x40   : > { %p1313_p3 = scmp.eq.s32.totalorder %s1064_s22, 1  ;;  %p805_p7 = scmp.lt.s32.totalorder %s1003_s21, 2 }
  0x41   : > { %s1175_s27 = scalar_select %p27_p6, %s999_s20, %s29_s14  }
  0x42   : > { %p1169_p5 = por %p1313_p3, %p36_p13  ;;  %p38_p9 = por %p37_p10, %p36_p13 }
  0x43   : > { %s208_s30 = sand.u32 1, %s999_s20   ;;  %s604_s6 = sshll.u32 %s1003_s21, 8 }
  0x44   : > { %s1314_s23 = scalar_select %p1169_p5, 1, 0 }
  0x45   : > { %s589_s7 = sshll.u32 %s208_s30, 4  ;;  %s1182_s10 = scalar_lea.hbm %s1300_s0, %s604_s6 }
  0x46   : > { %s212_s11 = scalar_lea.vmem [#allocation2], %s589_s7  ;;  %p1186_p11 = pnand %p805_p7, %p38_p9 }
  0x47   : > { %s219_s28 = sshll.u32 %s212_s11, 4  ;;  %s1190_s13 = scalar_lea.sflag [#allocation3], %s208_s30  ;;  %s1184_s28 = int_to_ptr.vmem [resolvable:$true] %s219_s28 }
  0x48   : > { %s903_s14 = scalar_lea.hbm %s1182_s10, 256  ;;  %p905_p0 = pneg %p1186_p11 }
  0x49   : > { %p904_p12 = scmp.ne.s32.totalorder %s1182_s10, %s903_s14  ;;  %s908_s6 = scalar_lea.hbm %s1300_s0, 512 }
  0x4a   : > { %p909_p13 = scmp.lt.u32.totalorder %s1182_s10, %s1300_s0  ;;  %p910_p6 = scmp.lt.u32.totalorder %s908_s6, %s903_s14 }
  0x4b   : > { %p906_p1 = pnand %p905_p0, %p904_p12  ;;  %p912_p3 = scmp.lt.u32.totalorder %s903_s14, %s1182_s10 }
  0x4c   : > { %p911_p10 = por %p910_p6, %p909_p13 }
  0x4d   : > { %p907_p2 = pneg %p906_p1 }
  0x4e   : > { %p913_p7 = por %p912_p3, %p911_p10 }
  0x50   : > { %p914_p9 = pnand %p913_p7, %p907_p2 }
  0x52   : > { %917 = shalt.err (!%p914_p9)
}
  0x53   : > { %s918_s30 = scalar_lea.vmem %s1184_s28, 256  ;;  %s1009_s11 = smov [#allocation2]  }
  0x54   : > { %p919_p12 = scmp.ne.s32.totalorder %s1184_s28, %s918_s30  ;;  %s923_s17 = sshll.u32 %s1009_s11, 4  ;;  %s924_s17 = int_to_ptr.vmem [resolvable:$false] %s923_s17 }
  0x55   : > { %s925_s7 = scalar_lea.vmem %s924_s17, 512  ;;  %p926_p4 = scmp.lt.s32.totalorder %s1184_s28, %s924_s17 }
  0x56   : > { %p921_p1 = pnand %p919_p12, %p905_p0  ;;  %p927_p13 = scmp.lt.s32.totalorder %s925_s7, %s918_s30 }
  0x58   : > { %p922_p5 = pneg %p921_p1  ;;  %p928_p6 = por %p927_p13, %p926_p4 }
  0x5a   : > { %p929_p10 = pnand %p928_p6, %p922_p5 }
  0x5c   : > { %932 = shalt.err (!%p929_p10)
}
  0x5d   : > { %798 = dma.hbm_to_vmem [thread:$0]  (!%p1186_p11), %s1182_s10, 256, %s1184_s28, %s1190_s13, %s1007_s15, %s1007_s15, %s1008_s16  }
  0x5e   : > { %231 = sbr.rel (%p1083_p8) target bundleno = 590 (0x24e), region = 40  ;;  %s1224_s14 = sand.u32 (!%p1083_p8), 1, %s995_s19  }
  0x5f   : > { %s593_s6 = sshll.u32 (!%p1083_p8), %s1224_s14, 4  ;;  %s234_s8 = scalar_lea.sflag (!%p1083_p8), [#allocation3], %s1224_s14 }
  0x60   : > { %s1230_s12 = scalar_lea.vmem (!%p1083_p8), [#allocation2], %s593_s6  ;;  %p1316_p4 = scmp.ne.s32.totalorder (!%p1083_p8), %s1309_s24, 0 }
  0x65   : > { %978 = dma.done.wait (%p1316_p4), %s234_s8, 256  }
  0x66   : > { %980 = vsyncadd (%p1316_p4), %s234_s8, 4294967040  ;;  %p1317_p5 = scmp.eq.s32.totalorder %s1064_s22, 0 }
  0x68   : > { %982 = dma.done.wait (%p1317_p5), [#allocation6], 4096   ;;  %p1318_p8 = pmov %p1317_p5 }
  0x69   : > { %v276_v0 = vld [vmem:[#allocation5] sm:$0xff]  ;;  %v277_v1 = vld [vmem:[#allocation5 + $0x8] sm:$0xff]  ;;  %v278_v2 = vld [vmem:[#allocation5 + $0x10] sm:$0xff]  ;;  %s271_s10 = scalar_lea.vmem [#allocation8], %s593_s6  ;;  %s605_s13 = sshll.u32 %s1064_s22, 8 }
  0x6a   : > { %984 = vsyncadd (%p1318_p8), [#allocation6], 4294963200  ;;  %v712_v3 = vpack.c.bf16 %v277_v1, %v276_v0  ;;  %v279_v4 = vld [vmem:[#allocation5 + $0x18] sm:$0xff]  ;;  %v280_v6 = vld [vmem:[#allocation5 + $0x20] sm:$0xff]  ;;  %s492_s28 = sshll.u32 %s271_s10, 4  ;;  %s1256_s11 = scalar_lea.hbm %s1305_s5, %s605_s13  ;;  %s1251_s28 = int_to_ptr.vmem [resolvable:$true] %s492_s28 }
  0x6b   : > { %v716_v5 = vpack.c.bf16 %v279_v4, %v278_v2  ;;  %v281_v7 = vld [vmem:[#allocation5 + $0x28] sm:$0xff]  ;;  %v282_v9 = vld [vmem:[#allocation5 + $0x30] sm:$0xff]  ;;  %v283_v10 = vld [vmem:[#allocation5 + $0x38] sm:$0xff]  ;;  %s479_s17 = scalar_lea.sflag [#allocation4], %s1224_s14  ;;  %s933_s7 = scalar_lea.vmem %s1251_s28, 256 }
  0x6c   : > { %713 = vmatprep.subr.bf16.mxu0 %v712_v3  ;;  %v720_v8 = vpack.c.bf16 %v281_v7, %v280_v6  ;;  %v274_v11 = vld [vmem:[%s1230_s12] sm:$0xff]  ;;  %v377_v13 = vld [vmem:[#allocation7 + $0x8] sm:$0xff]  ;;  %v379_v16 = vld [vmem:[#allocation7 + $0x18] sm:$0xff]  ;;  %v724_v20 = vpack.c.bf16 %v283_v10, %v282_v9  ;;  %p934_p11 = scmp.ne.s32.totalorder %s1251_s28, %s933_s7  ;;  %p1319_p0 = scmp.ne.s32.totalorder %s1314_s23, 0 }
  0x6d   : > { %715 = vmatpush3.bf16.msra.mxu0 %v712_v3  ;;  %674 = vmatprep.mubr.f32.mxu0 %v274_v11  ;;  %v376_v12 = vld [vmem:[#allocation7] sm:$0xff]  ;;  %v378_v14 = vld [vmem:[#allocation7 + $0x10] sm:$0xff]  ;;  %v381_v19 = vld [vmem:[#allocation7 + $0x28] sm:$0xff]  ;;  %s1010_s22 = smov [#allocation8]  }
  0x6e   : > { %717 = vmatprep.subr.bf16.mxu0 %v716_v5  ;;  %v744_v15 = vpack.c.bf16 %v377_v13, %v376_v12  ;;  %v748_v17 = vpack.c.bf16 %v379_v16, %v378_v14  ;;  %v380_v18 = vld [vmem:[#allocation7 + $0x20] sm:$0xff]  ;;  %v285_v22 = vld [vmem:[#allocation5 + $0x48] sm:$0xff]  ;;  %v382_v24 = vld [vmem:[#allocation7 + $0x30] sm:$0xff]  ;;  %p935_p2 = pnand %p934_p11, %p1319_p0  ;;  %s937_s6 = sshll.u32 %s1010_s22, 4  ;;  %s938_s6 = int_to_ptr.vmem [resolvable:$false] %s937_s6 }
  0x6f   : > { %v284_v21 = vld [vmem:[#allocation5 + $0x40] sm:$0xff]  ;;  %v752_v23 = vpack.c.bf16 %v381_v19, %v380_v18  ;;  %v383_v25 = vld [vmem:[#allocation7 + $0x38] sm:$0xff]  ;;  %v286_v27 = vld [vmem:[#allocation5 + $0x50] sm:$0xff]  ;;  %s939_s8 = scalar_lea.vmem %s938_s6, 512  ;;  %p940_p7 = scmp.lt.s32.totalorder %s1251_s28, %s938_s6 }
  0x70   : > { %745 = vmatprep.subr.bf16.mxu1 %v744_v15  ;;  %v728_v26 = vpack.c.bf16 %v285_v22, %v284_v21  ;;  %v287_v28 = vld [vmem:[#allocation5 + $0x58] sm:$0xff]  ;;  %v756_v29 = vpack.c.bf16 %v383_v25, %v382_v24  ;;  %v384_v30 = vld [vmem:[#allocation7 + $0x40] sm:$0xff]  ;;  %v385_v31 = vld [vmem:[#allocation7 + $0x48] sm:$0xff]  ;;  %p936_p3 = pneg %p935_p2  ;;  %p941_p9 = scmp.lt.s32.totalorder %s939_s8, %s933_s7 }
  0x71   : > { %719 = vmatpush3.bf16.msra.mxu0 %v716_v5  ;;  %747 = vmatpush3.bf16.msra.mxu1 %v744_v15  ;;  %v732_v32 = vpack.c.bf16 %v287_v28, %v286_v27  ;;  %v288_v33 = vld [vmem:[#allocation5 + $0x60] sm:$0xff]  ;;  %v289_v34 = vld [vmem:[#allocation5 + $0x68] sm:$0xff]  ;;  %v760_v35 = vpack.c.bf16 %v385_v31, %v384_v30  ;;  %v386_v36 = vld [vmem:[#allocation7 + $0x50] sm:$0xff] }
  0x72   : > { %721 = vmatprep.subr.bf16.mxu0 %v720_v8  ;;  %749 = vmatprep.subr.bf16.mxu1 %v748_v17  ;;  %v387_v37 = vld [vmem:[#allocation7 + $0x58] sm:$0xff]  ;;  %v736_v38 = vpack.c.bf16 %v289_v34, %v288_v33  ;;  %v290_v39 = vld [vmem:[#allocation5 + $0x70] sm:$0xff]  ;;  %v388_v42 = vld [vmem:[#allocation7 + $0x60] sm:$0xff]  ;;  %p942_p12 = por %p941_p9, %p940_p7 }
  0x73   : > { %v291_v40 = vld [vmem:[#allocation5 + $0x78] sm:$0xff]  ;;  %v764_v41 = vpack.c.bf16 %v387_v37, %v386_v36  ;;  %v389_v43 = vld [vmem:[#allocation7 + $0x68] sm:$0xff]  ;;  %v390_v47 = vld [vmem:[#allocation7 + $0x70] sm:$0xff] }
  0x74   : > { %v740_v44 = vpack.c.bf16 %v291_v40, %v290_v39  ;;  %v768_v45 = vpack.c.bf16 %v389_v43, %v388_v42  ;;  %v275_v46 = vld [vmem:[%s1230_s12 + $0x8] sm:$0xff]  ;;  %v597_v50 = vld [vmem:[%s1302_s2] ss:$0 sm:$0xff]  ;;  %p943_p1 = pnand %p942_p12, %p936_p3 }
  0x75   : > { %723 = vmatpush3.bf16.msra.mxu0 %v720_v8  ;;  %751 = vmatpush3.bf16.msra.mxu1 %v748_v17  ;;  %v391_v48 = vld [vmem:[#allocation7 + $0x78] sm:$0xff]  ;;  %v598_v57 = vld [vmem:[%s1304_s4] ss:$0 sm:$0xff] }
  0x76   : > { %725 = vmatprep.subr.bf16.mxu0 %v724_v20  ;;  %753 = vmatprep.subr.bf16.mxu1 %v752_v23  ;;  %v772_v49 = vpack.c.bf16 %v391_v48, %v390_v47 }
  0x79   : > { %727 = vmatpush3.bf16.msra.mxu0 %v724_v20  ;;  %755 = vmatpush3.bf16.msra.mxu1 %v752_v23 }
  0x7a   : > { %729 = vmatprep.subr.bf16.mxu0 %v728_v26  ;;  %757 = vmatprep.subr.bf16.mxu1 %v756_v29 }
  0x7d   : > { %731 = vmatpush3.bf16.msra.mxu0 %v728_v26  ;;  %759 = vmatpush3.bf16.msra.mxu1 %v756_v29 }
  0x7e   : > { %733 = vmatprep.subr.bf16.mxu0 %v732_v32  ;;  %761 = vmatprep.subr.bf16.mxu1 %v760_v35 }
  0x81   : > { %735 = vmatpush3.bf16.msra.mxu0 %v732_v32  ;;  %763 = vmatpush3.bf16.msra.mxu1 %v760_v35 }
  0x82   : > { %737 = vmatprep.subr.bf16.mxu0 %v736_v38  ;;  %765 = vmatprep.subr.bf16.mxu1 %v764_v41 }
  0x85   : > { %739 = vmatpush3.bf16.msra.mxu0 %v736_v38  ;;  %767 = vmatpush3.bf16.msra.mxu1 %v764_v41 }
  0x86   : > { %741 = vmatprep.subr.bf16.mxu0 %v740_v44  ;;  %769 = vmatprep.subr.bf16.mxu1 %v768_v45 }
  0x89   : > { %743 = vmatpush3.bf16.msra.mxu0 %v740_v44  ;;  %771 = vmatpush3.bf16.msra.mxu1 %v768_v45 }
  0x8a   : > { %773 = vmatprep.subr.bf16.mxu1 %v772_v49 }
  0x8c   : > { %675 = vmatmul.mubr.f32.vlgmr.msra.gmra.mrb[0].mxu0 %v275_v46 }
  0x8d   : > { %775 = vmatpush3.bf16.msra.mxu1 %v772_v49 }
 0x15f   : > { %v676_v51 = vpop.f32.mrb[0].mxu0 }
 0x160   : > { %v371_v52 = vadd.f32 %v676_v51, %v597_v50  ;;  %v365_v53 = vpop.f32.mrb[1].mxu0 }
 0x161   : > { %v366_v54 = vadd.f32 %v597_v50, %v365_v53 }
 0x162   : > { %v375_v56 = vmax.f32 %v371_v52, 0.0 }
 0x163   : > { %v374_v55 = vmax.f32 %v366_v54, 0.0 }
 0x165   : > { %709 = vmatprep.mubr.f32.mxu1 %v374_v55 }
 0x166   : > { %710 = vmatmul.mubr.f32.vlgmr.msra.gmra.mrb[0].mxu1 %v375_v56 }
 0x239   : > { %v711_v58 = vpop.f32.mrb[0].mxu1 }
 0x23a   : > { %v471_v59 = vadd.f32 %v711_v58, %v598_v57  ;;  %v465_v60 = vpop.f32.mrb[1].mxu1 }
 0x23b   : > { %v466_v61 = vadd.f32 %v598_v57, %v465_v60 }
 0x23c   : > { %v475_v62 = vmax.f32 %v471_v59, 0.0 }
 0x23d   : > { %v474_v63 = vmax.f32 %v466_v61, 0.0 }
 0x23e   : > { %477 = vst [vmem:[%s271_s10 + $0x8] sm:$0xff] %v475_v62 }
 0x23f   : > { %476 = vst [vmem:[%s271_s10] sm:$0xff] %v474_v63 }
 0x240   : > { %946 = shalt.err (!%p943_p1)
}
 0x241   : > { %s947_s12 = scalar_lea.hbm %s1256_s11, 256  ;;  %s951_s15 = scalar_lea.hbm %s1305_s5, 512 }
 0x242   : > { %p948_p13 = scmp.ne.s32.totalorder %s1256_s11, %s947_s12  ;;  %p952_p4 = scmp.lt.u32.totalorder %s1256_s11, %s1305_s5 }
 0x243   : > { %p953_p5 = scmp.lt.u32.totalorder %s951_s15, %s947_s12  ;;  %p955_p11 = scmp.lt.u32.totalorder %s947_s12, %s1256_s11 }
 0x244   : > { %p949_p6 = pnand %p948_p13, %p1319_p0 }
 0x245   : > { %p954_p8 = por %p953_p5, %p952_p4 }
 0x246   : > { %p950_p10 = pneg %p949_p6 }
 0x247   : > { %p956_p2 = por %p955_p11, %p954_p8 }
 0x249   : > { %p957_p3 = pnand %p956_p2, %p950_p10 }
 0x24b   : > { %960 = shalt.err (!%p957_p3)
}
 0x24c   : > { %s1011_s13 = smov 128   ;;  %s1012_s9 = smov 8  }
 0x24d   : > { %786 = dma.vmem_to_hbm [thread:$0]  (%p1319_p0), %s1251_s28, 256, %s1256_s11, %s479_s17, %s1011_s13, %s1011_s13, %s1012_s9  }
 0x24e PF: > { %s507_s30 = sand.u32 1, %s991_s18   ;;  %p1320_p7 = scmp.ne.s32.totalorder %s1310_s25, 0 }
 0x24f   : > { %p1321_p9 = scmp.ge.s32.totalorder %s1003_s21, 2  ;;  %s508_s7 = scalar_lea.sflag [#allocation4], %s507_s30 }
 0x251   : > { %p800_p12 = pnand %p1321_p9, %p1320_p7 }
 0x253   : > { %986 = dma.done.wait (!%p800_p12), %s508_s7, 256  }
 0x254   : > { %988 = vsyncadd (!%p800_p12), %s508_s7, 4294967040  ;;  %p19_p1 = scmp.ge.s32.totalorder %s1159_s29, 4   ;;  %s1322_s18 = smov %s995_s19 }
 0x255   : > { %s1323_s19 = smov %s999_s20  ;;  %s1324_s20 = smov %s1175_s27 }
 0x256   : > { %s1325_s21 = smov %s1159_s29  ;;  %21 = sbr.rel (!%p19_p1) target bundleno = 6 (0x6), region = 93 }
 0x25d   :  { %513 = vsyncpa [#allocation3], 1 }
 0x25e   :  { %515 = vsyncpa [#allocation3 + $0x1], 1 }
 0x25f   :  { %516 = vsyncpa [#allocation6], 1 }
 0x260   :  { %517 = vsyncpa [#allocation4], 1 }
 0x261   :  { %519 = vsyncpa [#allocation4 + $0x1], 1 }

</bundles_post_ra>
